<compile_context>
chip_gen: v6e
topology: v6e:2x2x1
jax: 0.10.0
libtpu: 0.0.40
codegen_flags: <defaults>
</compile_context>

<pallas_src>
import functools
import math

import jax
import jax.numpy as jnp
from jax import lax
from jax.experimental import pallas as pl
from jax.experimental.pallas import tpu as pltpu


def _round_up(x, m):
    return ((x + m - 1) // m) * m


# ---------------------------------------------------------------------------
# K / V projection kernel: y = x @ W^T   (nn.Linear with bias=False)
# ---------------------------------------------------------------------------
def _linear_kernel(x_ref, w_ref, o_ref):
    # Contract last dims of both operands -> x @ W^T with no transpose.
    y = lax.dot_general(
        x_ref[...], w_ref[...],
        dimension_numbers=(((1,), (1,)), ((), ())),
        preferred_element_type=jnp.float32)
    o_ref[...] = y.astype(o_ref.dtype)


def _linear_projection(x, w, *, tile_rows, out_dtype=jnp.bfloat16):
    seq, d_in = x.shape
    d_out = w.shape[0]
    return pl.pallas_call(
        _linear_kernel,
        out_shape=jax.ShapeDtypeStruct((seq, d_out), out_dtype),
        grid=(seq // tile_rows,),
        in_specs=[
            pl.BlockSpec((tile_rows, d_in), lambda i: (i, 0)),
            # Weights stay resident in VMEM across all row tiles.
            pl.BlockSpec((d_out, d_in), lambda i: (0, 0)),
        ],
        out_specs=pl.BlockSpec((tile_rows, d_out), lambda i: (i, 0)),
        compiler_params=pltpu.CompilerParams(
            dimension_semantics=("parallel",),
            vmem_limit_bytes=32 * 1024 * 1024),
    )(x, w)


# ---------------------------------------------------------------------------
# Flash-style attention kernel with fused Q projection and online softmax.
# ---------------------------------------------------------------------------
def _flash_attn_kernel(*refs, scale, use_bias):
    if use_bias:
        (tbl_ref, encq_ref, wq_ref, k_ref, v_ref, bias_ref,
         o_ref, q_sc, m_sc, l_sc, acc_sc) = refs
    else:
        (encq_ref, wq_ref, k_ref, v_ref,
         o_ref, q_sc, m_sc, l_sc, acc_sc) = refs
        tbl_ref = bias_ref = None

    qi = pl.program_id(0)
    kv = pl.program_id(1)
    num_kv = pl.num_programs(1)

    @pl.when(kv == 0)
    def _init():
        # Fused Q projection (no HBM round trip for q):
        #   q = (enc_q @ W_q^T) * log2(e) / sqrt(d_model)
        # computed once per q tile, kept resident in VMEM as bf16.
        q = lax.dot_general(
            encq_ref[...], wq_ref[...],
            dimension_numbers=(((1,), (1,)), ((), ())),
            preferred_element_type=jnp.float32)
        q_sc[...] = (q * jnp.float32(scale)).astype(q_sc.dtype)
        m_sc[...] = jnp.full(m_sc.shape, -jnp.inf, jnp.float32)
        l_sc[...] = jnp.zeros(l_sc.shape, jnp.float32)
        acc_sc[...] = jnp.zeros(acc_sc.shape, jnp.float32)

    def _compute():
        # q already carries log2(e)/sqrt(d_model); contract last dims so
        # q @ k^T needs no transpose (MXU, f32 accumulation).
        s = lax.dot_general(
            q_sc[...], k_ref[...],
            dimension_numbers=(((1,), (1,)), ((), ())),
            preferred_element_type=jnp.float32)              # [tq, tk] f32
        if use_bias:
            # 0 where live, -1e9 where user-masked (masked_fill semantics),
            # -inf on key padding (exact zero probability).
            s = s + bias_ref[...].astype(jnp.float32)

        m_prev = m_sc[...]
        m_new = jnp.maximum(m_prev, jnp.max(s, axis=-1, keepdims=True))
        alpha = jnp.exp2(m_prev - m_new)
        p = jnp.exp2(s - m_new)

        l_sc[...] = alpha * l_sc[...] + jnp.sum(p, axis=-1, keepdims=True)
        acc_sc[...] = alpha * acc_sc[...] + jnp.dot(
            p.astype(v_ref.dtype), v_ref[...],
            preferred_element_type=jnp.float32)
        m_sc[...] = m_new

    if use_bias:
        # Skip (qi, ki) tiles with no live (unmasked, non-padding) position.
        pl.when(tbl_ref[qi * num_kv + kv] != 0)(_compute)
    else:
        _compute()

    @pl.when(kv == num_kv - 1)
    def _finalize():
        l = l_sc[...]
        # Rows whose every kv tile was skipped (padded query rows, or the
        # degenerate "entire row masked" case) have l == 0; guard 0 * inf.
        l = jnp.where(l == 0.0, jnp.float32(1.0), l)
        o_ref[...] = (acc_sc[...] / l).astype(o_ref.dtype)


# ---------------------------------------------------------------------------
# Wrapper: padding, tiling, bias/table construction, pallas_call.
# ---------------------------------------------------------------------------
def attention_forward(enc_q, enc_k, enc_v, w_q, w_k, w_v, mask=None, *,
                      max_tq=256, max_tk=512, compute_dtype=jnp.bfloat16):
    """Pallas equivalent of Attention.forward.

    enc_q: [seq_q, d_model], enc_k/enc_v: [seq_k, d_model]
    w_q/w_k/w_v: [d_model, d_model] (PyTorch [out, in] layout)
    mask: optional [seq_q, seq_k]; nonzero / True => position masked out.
    Returns float32 [seq_q, d_model].
    """
    seq_q, d_model = enc_q.shape
    seq_k = enc_k.shape[0]

    # --- lane / tile geometry ------------------------------------------------
    d_pad = _round_up(d_model, 128)               # lane-dense stores, full MXU rows
    max_tq = max(128, (max_tq // 128) * 128)
    max_tk = max(128, (max_tk // 128) * 128)

    if seq_q <= max_tq:
        tq = _round_up(seq_q, 8)                  # single q tile
    else:
        tq = max_tq
    # v7x has 2 TensorCores: once there's real work, keep >= 2 q tiles so the
    # "parallel" axis actually shards across both cores.
    if seq_q >= 512:
        tq = min(tq, _round_up(-(-seq_q // 2), 128))
    seq_q_pad = _round_up(seq_q, tq)

    if seq_k <= max_tk:
        tk = _round_up(seq_k, 8)                  # single kv tile (full extent)
    else:
        tk = max_tk                               # multiple of 128 by construction
    seq_k_pad = _round_up(seq_k, tk)

    nq = seq_q_pad // tq
    nk = seq_k_pad // tk

    # --- padded, compute-dtype operands -------------------------------------
    def _pad2(a, rows, cols):
        r, c = a.shape
        if r == rows and c == cols:
            return a
        return jnp.pad(a, ((0, rows - r), (0, cols - c)))

    cd = compute_dtype
    enc_q_p = _pad2(enc_q.astype(jnp.float32), seq_q_pad, d_pad).astype(cd)
    enc_k_p = _pad2(enc_k.astype(jnp.float32), seq_k_pad, d_pad).astype(cd)
    enc_v_p = _pad2(enc_v.astype(jnp.float32), seq_k_pad, d_pad).astype(cd)
    w_q_p = _pad2(w_q.astype(jnp.float32), d_pad, d_pad).astype(cd)
    w_k_p = _pad2(w_k.astype(jnp.float32), d_pad, d_pad).astype(cd)
    w_v_p = _pad2(w_v.astype(jnp.float32), d_pad, d_pad).astype(cd)

    # Project K/V once (reused across all q tiles).  Q is fused into the
    # attention kernel below.
    k = _linear_projection(enc_k_p, w_k_p, tile_rows=tk, out_dtype=cd)
    v = _linear_projection(enc_v_p, w_v_p, tile_rows=tk, out_dtype=cd)

    # Fold log2(e) into the softmax scale so the kernel can use exp2.
    # The scale uses the ORIGINAL d_model (matches k.size(col_dim)**0.5).
    scale = math.log2(math.e) / math.sqrt(float(d_model))

    use_bias = (mask is not None) or (seq_k_pad != seq_k)
    if use_bias:
        bias = jnp.zeros((seq_q_pad, seq_k_pad), jnp.float32)
        if mask is not None:
            bias = bias.at[:seq_q, :seq_k].set(
                jnp.where(mask.astype(bool), jnp.float32(-1e9), jnp.float32(0.0)))
        if seq_k_pad != seq_k:
            bias = bias.at[:, seq_k:].set(-jnp.inf)    # key padding -> prob 0
        # Per-(q tile, kv tile) "any live position" table; dead tiles are
        # skipped inside the kernel (SMEM scalar read + pl.when).
        live = bias == 0.0
        tbl = live.reshape(nq, tq, nk, tk).any(axis=(1, 3))
        tbl = tbl.reshape(-1).astype(jnp.int32)
        bias = bias.astype(cd)

    kernel = functools.partial(_flash_attn_kernel, scale=scale,
                               use_bias=use_bias)

    scratch = [
        pltpu.VMEM((tq, d_pad), cd),             # q tile (fused projection)
        pltpu.VMEM((tq, 1), jnp.float32),        # running max  m
        pltpu.VMEM((tq, 1), jnp.float32),        # running sum  l
        pltpu.VMEM((tq, d_pad), jnp.float32),    # output accumulator
    ]

    if use_bias:
        grid_spec = pltpu.PrefetchScalarGridSpec(
            num_scalar_prefetch=1,
            grid=(nq, nk),
            in_specs=[
                pl.BlockSpec((tq, d_pad), lambda qi, ki, tbl: (qi, 0)),    # enc_q
                pl.BlockSpec((d_pad, d_pad), lambda qi, ki, tbl: (0, 0)),  # W_q
                pl.BlockSpec((tk, d_pad), lambda qi, ki, tbl: (ki, 0)),    # K
                pl.BlockSpec((tk, d_pad), lambda qi, ki, tbl: (ki, 0)),    # V
                pl.BlockSpec((tq, tk), lambda qi, ki, tbl: (qi, ki)),      # bias
            ],
            out_specs=pl.BlockSpec((tq, d_pad), lambda qi, ki, tbl: (qi, 0)),
            scratch_shapes=scratch)
        args = (tbl, enc_q_p, w_q_p, k, v, bias)
    else:
        grid_spec = pltpu.PrefetchScalarGridSpec(
            num_scalar_prefetch=0,
            grid=(nq, nk),
            in_specs=[
                pl.BlockSpec((tq, d_pad), lambda qi, ki: (qi, 0)),         # enc_q
                pl.BlockSpec((d_pad, d_pad), lambda qi, ki: (0, 0)),       # W_q
                pl.BlockSpec((tk, d_pad), lambda qi, ki: (ki, 0)),         # K
                pl.BlockSpec((tk, d_pad), lambda qi, ki: (ki, 0)),         # V
            ],
            out_specs=pl.BlockSpec((tq, d_pad), lambda qi, ki: (qi, 0)),
            scratch_shapes=scratch)
        args = (enc_q_p, w_q_p, k, v)

    out = pl.pallas_call(
        kernel,
        out_shape=jax.ShapeDtypeStruct((seq_q_pad, d_pad), jnp.float32),
        grid_spec=grid_spec,
        compiler_params=pltpu.CompilerParams(
            dimension_semantics=("parallel", "arbitrary"),
            vmem_limit_bytes=32 * 1024 * 1024),
    )(*args)

    # Slice the lane/row padding back off (interface unchanged).
    return out[:seq_q, :d_model]


# ---------------------------------------------------------------------------
# Pure-JAX reference (mirrors the PyTorch module exactly, f32 math).
# ---------------------------------------------------------------------------
def _reference(enc_q, enc_k, enc_v, w_q, w_k, w_v, mask=None):
    q = enc_q @ w_q.T
    k = enc_k @ w_k.T
    v = enc_v @ w_v.T
    sims = q @ k.T
    scaled = sims / jnp.sqrt(jnp.float32(k.shape[1]))
    if mask is not None:
        scaled = jnp.where(mask, -1e9, scaled)
    probs = jax.nn.softmax(scaled, axis=1)
    return probs @ v


if __name__ == "__main__":
    key = jax.random.PRNGKey(0)
    tol = dict(atol=2.5e-2, rtol=2.5e-2)   # bf16 MXU operands vs f32 reference

    # ---- test 1: tiny shapes matching the module (seq=8, d_model=32) -------
    seq, d_model = 8, 32
    k0, k1, k2, k3, k4, k5, k6 = jax.random.split(key, 7)
    enc_q = jax.random.normal(k0, (seq, d_model), dtype=jnp.float32)
    enc_k = jax.random.normal(k1, (seq, d_model), dtype=jnp.float32)
    enc_v = jax.random.normal(k2, (seq, d_model), dtype=jnp.float32)
    bound = 1.0 / math.sqrt(d_model)
    w_q = jax.random.uniform(k3, (d_model, d_model), jnp.float32, -bound, bound)
    w_k = jax.random.uniform(k4, (d_model, d_model), jnp.float32, -bound, bound)
    w_v = jax.random.uniform(k5, (d_model, d_model), jnp.float32, -bound, bound)

    out = jax.block_until_ready(
        attention_forward(enc_q, enc_k, enc_v, w_q, w_k, w_v))
    ref = _reference(enc_q, enc_k, enc_v, w_q, w_k, w_v)
    assert out.shape == (seq, d_model)
    assert jnp.allclose(out, ref, **tol), float(jnp.max(jnp.abs(out - ref)))

    causal = jnp.triu(jnp.ones((seq, seq), dtype=bool), k=1)
    out_m = jax.block_until_ready(
        attention_forward(enc_q, enc_k, enc_v, w_q, w_k, w_v, mask=causal))
    ref_m = _reference(enc_q, enc_k, enc_v, w_q, w_k, w_v, mask=causal)
    assert jnp.allclose(out_m, ref_m, **tol), \
        float(jnp.max(jnp.abs(out_m - ref_m)))

    # ---- test 2: multi-tile grid + seq/d padding + block skipping ----------
    seq2, d2 = 300, 40                    # non-multiples: exercises padding
    kk = jax.random.split(k6, 6)
    enc_q2 = jax.random.normal(kk[0], (seq2, d2), dtype=jnp.float32)
    enc_k2 = jax.random.normal(kk[1], (seq2, d2), dtype=jnp.float32)
    enc_v2 = jax.random.normal(kk[2], (seq2, d2), dtype=jnp.float32)
    b2 = 1.0 / math.sqrt(d2)
    w_q2 = jax.random.uniform(kk[3], (d2, d2), jnp.float32, -b2, b2)
    w_k2 = jax.random.uniform(kk[4], (d2, d2), jnp.float32, -b2, b2)
    w_v2 = jax.random.uniform(kk[5], (d2, d2), jnp.float32, -b2, b2)
    causal2 = jnp.triu(jnp.ones((seq2, seq2), dtype=bool), k=1)

    out2 = jax.block_until_ready(
        attention_forward(enc_q2, enc_k2, enc_v2, w_q2, w_k2, w_v2,
                          mask=causal2, max_tq=128, max_tk=128))
    ref2 = _reference(enc_q2, enc_k2, enc_v2, w_q2, w_k2, w_v2, mask=causal2)
    assert out2.shape == (seq2, d2)
    assert jnp.allclose(out2, ref2, **tol), \
        float(jnp.max(jnp.abs(out2 - ref2)))

    print("KERNEL_OK")
</pallas_src>

<mosaic_0001>
module attributes {stable_mosaic.version = 11 : i64} {
  func.func @_linear_kernel(%arg0: i32, %arg1: memref<8x128xbf16, #tpu.memory_space<vmem>>, %arg2: memref<128x128xbf16, #tpu.memory_space<vmem>>, %arg3: memref<8x128xbf16, #tpu.memory_space<vmem>>) attributes {dimension_semantics = [#tpu.dimension_semantics<parallel>], iteration_bounds = array<i64: 1>, scalar_prefetch = 0 : i64, scratch_operands = 0 : i64, tpu.core_type = #tpu.core_type<tc>, window_params = [{transform_indices = @transform_0, window_bounds = array<i64: 8, 128>}, {pipeline_mode = #tpu.pipeline_mode<synchronous>, transform_indices = @transform_1, window_bounds = array<i64: 128, 128>}, {transform_indices = @transform_2, window_bounds = array<i64: 8, 128>}]} {
    %c0 = arith.constant 0 : index
    %c0_0 = arith.constant 0 : index
    %0 = vector.load %arg1[%c0, %c0_0] : memref<8x128xbf16, #tpu.memory_space<vmem>>, vector<8x128xbf16>
    %c0_1 = arith.constant 0 : index
    %c0_2 = arith.constant 0 : index
    %1 = vector.load %arg2[%c0_1, %c0_2] : memref<128x128xbf16, #tpu.memory_space<vmem>>, vector<128x128xbf16>
    %cst = arith.constant dense<0.000000e+00> : vector<8x128xf32>
    %2 = tpu.matmul %0, %1, %cst {dimension_numbers = #tpu.dot_dimension_numbers<[1], [1], [0], [0], [0, 0, 1, 0], [], []>} : vector<8x128xbf16>, vector<128x128xbf16>, vector<8x128xf32> -> vector<8x128xf32>
    %3 = arith.truncf %2 : vector<8x128xf32> to vector<8x128xbf16>
    %c0_3 = arith.constant 0 : index
    %c0_4 = arith.constant 0 : index
    %4 = vector.load %arg3[%c0_3, %c0_4] : memref<8x128xbf16, #tpu.memory_space<vmem>>, vector<8x128xbf16>
    tpu.vector_store %arg3[%c0_3, %c0_4], %3 {strides = array<i32>} : memref<8x128xbf16, #tpu.memory_space<vmem>>, vector<8x128xbf16>,
    return
  }
  func.func @transform_0(%arg0: i32) -> (i32, i32) {
    %c0_i32 = arith.constant 0 : i32
    %c0_i32_0 = arith.constant 0 : i32
    return %arg0, %c0_i32 : i32, i32
  }
  func.func @transform_1(%arg0: i32) -> (i32, i32) {
    %c0_i32 = arith.constant 0 : i32
    %c0_i32_0 = arith.constant 0 : i32
    %c0_i32_1 = arith.constant 0 : i32
    return %c0_i32, %c0_i32_0 : i32, i32
  }
  func.func @transform_2(%arg0: i32) -> (i32, i32) {
    %c0_i32 = arith.constant 0 : i32
    %c0_i32_0 = arith.constant 0 : i32
    return %arg0, %c0_i32 : i32, i32
  }
}

</mosaic_0001>

<bundles_post_ra>
// kernel: tpu_custom_call.1
= control target key start
LH: loop header
LB: loop body
LE: loop exit
PB: predicated region body
PF: predicated region fallthrough
CT: control target
= control target key end

     0   :  { %7 = vsyncpa [#allocation3], 0  ;;  %s311_s0 = inlined_call_operand.hbm [shape: bf16[8,128], index: 0, kind: input, shape index: {}]   ;;  %s312_s1 = inlined_call_operand.hbm [shape: bf16[128,128], index: 1, kind: input, shape index: {}]   ;;  %s313_s2 = inlined_call_operand.hbm [shape: bf16[8,128], index: 2, kind: output, shape index: {}]  }
   0x1   :  { %8 = vsyncpa [#allocation6], 0 }
   0x2   :  { %9 = vsyncpa [#allocation4], 0  ;;  %s280_s9 = smov [#allocation2]   ;;  %s281_s11 = smov [#allocation5]  }
   0x3   :  { %s16_s10 = sshll.u32 %s280_s9, 4  ;;  %s25_s12 = sshll.u32 %s281_s11, 4  ;;  %s17_s10 = int_to_ptr.vmem [resolvable:$true] %s16_s10  ;;  %s26_s12 = int_to_ptr.vmem [resolvable:$true] %s25_s12 }
   0x4   :  { %s222_s13 = scalar_lea.vmem %s17_s10, 64  ;;  %p227_p1 = scmp.lt.s32.totalorder %s17_s10, %s17_s10 }
   0x5   :  { %p223_p0 = scmp.ne.s32.totalorder %s17_s10, %s222_s13  ;;  %p228_p2 = scmp.lt.s32.totalorder %s222_s13, %s222_s13 }
   0x7   :  { %p229_p3 = por %p228_p2, %p227_p1 }
   0x9   :  { %p230_p4 = pnand %p229_p3, %p223_p0 }
   0xb   :  { %233 = shalt.err (!%p230_p4)
}
   0xc   :  { %19 = dma.hbm_to_vmem [thread:$0]  %s311_s0, 64, %s17_s10, [#allocation3]  }
   0xd   :  { %s242_s16 = scalar_lea.vmem %s26_s12, 1024  ;;  %p247_p6 = scmp.lt.s32.totalorder %s26_s12, %s26_s12 }
   0xe   :  { %p243_p5 = scmp.ne.s32.totalorder %s26_s12, %s242_s16  ;;  %p248_p7 = scmp.lt.s32.totalorder %s242_s16, %s242_s16 }
  0x10   :  { %p249_p8 = por %p248_p7, %p247_p6 }
  0x12   :  { %p250_p9 = pnand %p249_p8, %p243_p5 }
  0x14   :  { %253 = shalt.err (!%p250_p9)
}
  0x15   :  { %s282_s17 = smov 64   ;;  %s283_s18 = smov 4  }
  0x16   :  { %31 = dma.hbm_to_vmem [thread:$0]  %s312_s1, 1024, %s26_s12, [#allocation6], %s282_s17, %s282_s17, %s283_s18  }
  0x17   :  { %274 = dma.done.wait [#allocation3], 64  }
  0x18   :  { %275 = vsyncadd [#allocation3], 4294967232 }
  0x19   :  { %276 = dma.done.wait [#allocation6], 1024  }
  0x1a   :  { %277 = vsyncadd [#allocation6], 4294966272  ;;  %v284_v0 = vmov 0.0   ;;  %vm285_vm0 = vmmov 0   ;;  %v206_v1 = vld [vmem:[#allocation5 + $0x38] sm:$0xff]   ;;  %v207_v2 = vld [vmem:[#allocation5 + $0x30] sm:$0xff]  }
  0x1b   :  { %179 = vmatprep.subr.bf16.mxu0 %v284_v0  ;;  %195 = vmatprep.mubr.msk.bf16.mxu0 %vm285_vm0, %v284_v0  ;;  %v208_v3 = vld [vmem:[#allocation5 + $0x28] sm:$0xff]   ;;  %v209_v4 = vld [vmem:[#allocation5 + $0x20] sm:$0xff]   ;;  %v210_v5 = vld [vmem:[#allocation5 + $0x18] sm:$0xff]   ;;  %s286_s0 = smov [#allocation7]  }
  0x1c   :  { %180 = vmatpush3.bf16.xpose.msra.mxu0 %v206_v1  ;;  %v211_v6 = vld [vmem:[#allocation5 + $0x10] sm:$0xff]   ;;  %v212_v7 = vld [vmem:[#allocation5 + $0x8] sm:$0xff]   ;;  %v213_v8 = vld [vmem:[#allocation5] sm:$0xff]   ;;  %s152_s1 = sshll.u32 %s286_s0, 4  ;;  %s153_s1 = int_to_ptr.vmem [resolvable:$true] %s152_s1 }
  0x1d   :  { %181 = vmatprep.subr.bf16.mxu0 %v284_v0  ;;  %v39_v9 = vld [vmem:[#allocation2] sm:$0xf]  ;;  %s254_s21 = scalar_lea.vmem %s153_s1, 64  ;;  %p259_p11 = scmp.lt.s32.totalorder %s153_s1, %s153_s1 }
  0x1e   :  { %p255_p10 = scmp.ne.s32.totalorder %s153_s1, %s254_s21  ;;  %p260_p12 = scmp.lt.s32.totalorder %s254_s21, %s254_s21 }
  0x20   :  { %p261_p13 = por %p260_p12, %p259_p11 }
  0x22   :  { %p262_p0 = pnand %p261_p13, %p255_p10 }
  0x24   :  { %182 = vmatpush3.bf16.xpose.msra.mxu0 %v207_v2 }
  0x25   :  { %183 = vmatprep.subr.bf16.mxu0 %v284_v0 }
  0x2c   :  { %184 = vmatpush3.bf16.xpose.msra.mxu0 %v208_v3 }
  0x2d   :  { %185 = vmatprep.subr.bf16.mxu0 %v284_v0 }
  0x34   :  { %186 = vmatpush3.bf16.xpose.msra.mxu0 %v209_v4 }
  0x35   :  { %187 = vmatprep.subr.bf16.mxu0 %v284_v0 }
  0x3c   :  { %188 = vmatpush3.bf16.xpose.msra.mxu0 %v210_v5 }
  0x3d   :  { %189 = vmatprep.subr.bf16.mxu0 %v284_v0 }
  0x44   :  { %190 = vmatpush3.bf16.xpose.msra.mxu0 %v211_v6 }
  0x45   :  { %191 = vmatprep.subr.bf16.mxu0 %v284_v0 }
  0x4c   :  { %192 = vmatpush3.bf16.xpose.msra.mxu0 %v212_v7 }
  0x4d   :  { %193 = vmatprep.subr.bf16.mxu0 %v284_v0 }
  0x54   :  { %194 = vmatpush3.bf16.xpose.msra.mxu0 %v213_v8 }
  0x5b   :  { %196 = vmatmul.mubr.bf16.vlgmr.msra.gmra.mxu0 %v39_v9 }
 0x11b   :  { %v138_v10 = vpop.f32.mrf.mxu0 }
 0x11c   :  { %v144_v11 = vpack.c.bf16 %v138_v10, %v138_v10 }
 0x11d   :  { %v197_v12 = vpop.f32.mrf.mxu0 }
 0x11e   :  { %145 = vst [vmem:[#allocation7] sm:$0xf] %v144_v11 }
 0x11f   :  { %v141_v13 = vpop.f32.mrf.mxu0 }
 0x120   :  { %265 = shalt.err (!%p262_p0)
}
 0x121   :  { %155 = dma.vmem_to_hbm [thread:$0]  %s153_s1, 64, %s313_s2, [#allocation4]   ;;  %v198_v14 = vpop.f32.mrf.mxu0 }
 0x122   :  { %278 = dma.done.wait [#allocation4], 64  }
 0x123   :  { %279 = vsyncadd [#allocation4], 4294967232 }
 0x124   :  { %159 = vsyncpa [#allocation3], 1 }
 0x125   :  { %160 = vsyncpa [#allocation6], 1 }
 0x126   :  { %161 = vsyncpa [#allocation4], 1 }

</bundles_post_ra>
